<compile_context>
chip_gen: v7x
topology: tpu7x:2x2x1
jax: 0.10.0
libtpu: 0.0.40
codegen_flags: <defaults>
</compile_context>

<pallas_src>
import jax
import jax.numpy as jnp
from jax.experimental import pallas as pl
from jax.experimental.pallas import tpu as pltpu

IN_FEATURES = 3
OUT_FEATURES = 4


def _round_up(n, m):
    return ((n + m - 1) // m) * m


def linear_kernel(w_ref, b_ref, xT_ref, oT_ref):
    # w_ref : SMEM (OUT, IN)  float32 scalars
    # b_ref : SMEM (OUT,)     float32 scalars
    # xT_ref: VMEM (IN,  blk) lane-dense activation tile
    # oT_ref: VMEM (OUT, blk) lane-dense output tile
    # Load the 3 input rows once (full-lane vector loads).
    x_rows = [xT_ref[k:k + 1, :] for k in range(IN_FEATURES)]  # each (1, blk)
    # 4 output rows = VPU broadcast multiply-adds over the 3 input rows.
    for o in range(OUT_FEATURES):  # static, unrolled
        acc = w_ref[o, 0] * x_rows[0]
        for k in range(1, IN_FEATURES):
            acc = acc + w_ref[o, k] * x_rows[k]
        oT_ref[o:o + 1, :] = acc + b_ref[o]


def decoder_forward(x, weight, bias, *, tile_b=2048):
    """x: (B, 3) float32, weight: (4, 3), bias: (4,) -> (B, 4) float32."""
    B = x.shape[0]
    tile_b = _round_up(tile_b, 128)
    blk = min(tile_b, _round_up(max(B, 1), 128))   # lane-tile (multiple of 128)
    b_pad = _round_up(B, blk)                      # padded batch extent
    grid = (b_pad // blk,)

    # Wrapper-side layout plumbing: lane-dense slab (IN, B_pad), zero-padded.
    xT = jnp.pad(x.T, ((0, 0), (0, b_pad - B)))

    outT = pl.pallas_call(
        linear_kernel,
        out_shape=jax.ShapeDtypeStruct((OUT_FEATURES, b_pad), x.dtype),
        grid=grid,
        in_specs=[
            pl.BlockSpec(memory_space=pltpu.MemorySpace.SMEM),  # weight (4, 3)
            pl.BlockSpec(memory_space=pltpu.MemorySpace.SMEM),  # bias   (4,)
            # (IN, blk): first dim equals full array dim (3), last dim is a
            # multiple of 128 -> satisfies the (8, 128) BlockSpec rule.
            pl.BlockSpec((IN_FEATURES, blk), lambda i: (0, i)),
        ],
        out_specs=pl.BlockSpec((OUT_FEATURES, blk), lambda i: (0, i)),
        compiler_params=pltpu.CompilerParams(
            dimension_semantics=("parallel",),  # shard B tiles across TCs (v7x)
        ),
    )(weight, bias, xT)

    # Back to the PyTorch-style (B, OUT) row-major layout.
    return outT[:, :B].T


def decoder_forward_xla(x, weight, bias):
    # Recommended path for tiny B (overhead-bound regime): let XLA fuse it.
    return x @ weight.T + bias


def init_params(key):
    # Deterministic init mimicking torch.nn.Linear default:
    # U(-1/sqrt(fan_in), 1/sqrt(fan_in)) for both weight and bias.
    kw, kb = jax.random.split(key)
    bound = 1.0 / jnp.sqrt(jnp.float32(IN_FEATURES))
    weight = jax.random.uniform(
        kw, (OUT_FEATURES, IN_FEATURES), dtype=jnp.float32,
        minval=-bound, maxval=bound)
    bias = jax.random.uniform(
        kb, (OUT_FEATURES,), dtype=jnp.float32, minval=-bound, maxval=bound)
    return weight, bias


if __name__ == "__main__":
    key = jax.random.PRNGKey(0)
    k_x, k_x2, k_p = jax.random.split(key, 3)

    weight, bias = init_params(k_p)

    # Small-shape run consistent with the module (batch=8, in_features=3).
    B = 8
    x = jax.random.normal(k_x, (B, IN_FEATURES), dtype=jnp.float32)
    out = jax.block_until_ready(decoder_forward(x, weight, bias))
    ref = x @ weight.T + bias
    assert out.shape == (B, OUT_FEATURES)
    assert jnp.allclose(out, ref, atol=1e-5, rtol=1e-5)

    # Extra check: non-multiple-of-128 batch with a multi-step grid
    # (exercises padding, index_map and the parallel grid axis).
    B2 = 300
    x2 = jax.random.normal(k_x2, (B2, IN_FEATURES), dtype=jnp.float32)
    out2 = jax.block_until_ready(decoder_forward(x2, weight, bias, tile_b=128))
    ref2 = x2 @ weight.T + bias
    assert out2.shape == (B2, OUT_FEATURES)
    assert jnp.allclose(out2, ref2, atol=1e-5, rtol=1e-5)

    print("KERNEL_OK")
</pallas_src>

<mosaic_0001>
module attributes {stable_mosaic.version = 11 : i64} {
  func.func @linear_kernel(%arg0: i32, %arg1: memref<4x3xf32, #tpu.memory_space<smem>>, %arg2: memref<4xf32, #tpu.memory_space<smem>>, %arg3: memref<3x128xf32, #tpu.memory_space<vmem>>, %arg4: memref<4x128xf32, #tpu.memory_space<vmem>>) attributes {dimension_semantics = [#tpu.dimension_semantics<parallel>], iteration_bounds = array<i64: 1>, scalar_prefetch = 0 : i64, scratch_operands = 0 : i64, tpu.core_type = #tpu.core_type<tc>, window_params = [{transform_indices = @transform_0, window_bounds = array<i64: 4, 3>}, {transform_indices = @transform_1, window_bounds = array<i64: 4>}, {transform_indices = @transform_2, window_bounds = array<i64: 3, 128>}, {transform_indices = @transform_3, window_bounds = array<i64: 4, 128>}]} {
    %c0 = arith.constant 0 : index
    %c0_0 = arith.constant 0 : index
    %0 = vector.load %arg3[%c0, %c0_0] : memref<3x128xf32, #tpu.memory_space<vmem>>, vector<1x128xf32>
    %c1 = arith.constant 1 : index
    %c0_1 = arith.constant 0 : index
    %1 = vector.load %arg3[%c1, %c0_1] : memref<3x128xf32, #tpu.memory_space<vmem>>, vector<1x128xf32>
    %c2 = arith.constant 2 : index
    %c0_2 = arith.constant 0 : index
    %2 = vector.load %arg3[%c2, %c0_2] : memref<3x128xf32, #tpu.memory_space<vmem>>, vector<1x128xf32>
    %c0_3 = arith.constant 0 : index
    %c0_4 = arith.constant 0 : index
    %3 = memref.load %arg1[%c0_3, %c0_4] : memref<4x3xf32, #tpu.memory_space<smem>>
    %4 = vector.broadcast %3 : f32 to vector<1x128xf32>
    %5 = arith.mulf %4, %0 : vector<1x128xf32>
    %c0_5 = arith.constant 0 : index
    %c1_6 = arith.constant 1 : index
    %6 = memref.load %arg1[%c0_5, %c1_6] : memref<4x3xf32, #tpu.memory_space<smem>>
    %7 = vector.broadcast %6 : f32 to vector<1x128xf32>
    %8 = arith.mulf %7, %1 : vector<1x128xf32>
    %9 = arith.addf %5, %8 : vector<1x128xf32>
    %c0_7 = arith.constant 0 : index
    %c2_8 = arith.constant 2 : index
    %10 = memref.load %arg1[%c0_7, %c2_8] : memref<4x3xf32, #tpu.memory_space<smem>>
    %11 = vector.broadcast %10 : f32 to vector<1x128xf32>
    %12 = arith.mulf %11, %2 : vector<1x128xf32>
    %13 = arith.addf %9, %12 : vector<1x128xf32>
    %c0_9 = arith.constant 0 : index
    %14 = memref.load %arg2[%c0_9] : memref<4xf32, #tpu.memory_space<smem>>
    %15 = vector.broadcast %14 : f32 to vector<1x128xf32>
    %16 = arith.addf %13, %15 : vector<1x128xf32>
    %c0_10 = arith.constant 0 : index
    %c0_11 = arith.constant 0 : index
    %17 = vector.load %arg4[%c0_10, %c0_11] : memref<4x128xf32, #tpu.memory_space<vmem>>, vector<1x128xf32>
    tpu.vector_store %arg4[%c0_10, %c0_11], %16 {strides = array<i32>} : memref<4x128xf32, #tpu.memory_space<vmem>>, vector<1x128xf32>,
    %c1_12 = arith.constant 1 : index
    %c0_13 = arith.constant 0 : index
    %18 = memref.load %arg1[%c1_12, %c0_13] : memref<4x3xf32, #tpu.memory_space<smem>>
    %19 = vector.broadcast %18 : f32 to vector<1x128xf32>
    %20 = arith.mulf %19, %0 : vector<1x128xf32>
    %c1_14 = arith.constant 1 : index
    %c1_15 = arith.constant 1 : index
    %21 = memref.load %arg1[%c1_14, %c1_15] : memref<4x3xf32, #tpu.memory_space<smem>>
    %22 = vector.broadcast %21 : f32 to vector<1x128xf32>
    %23 = arith.mulf %22, %1 : vector<1x128xf32>
    %24 = arith.addf %20, %23 : vector<1x128xf32>
    %c1_16 = arith.constant 1 : index
    %c2_17 = arith.constant 2 : index
    %25 = memref.load %arg1[%c1_16, %c2_17] : memref<4x3xf32, #tpu.memory_space<smem>>
    %26 = vector.broadcast %25 : f32 to vector<1x128xf32>
    %27 = arith.mulf %26, %2 : vector<1x128xf32>
    %28 = arith.addf %24, %27 : vector<1x128xf32>
    %c1_18 = arith.constant 1 : index
    %29 = memref.load %arg2[%c1_18] : memref<4xf32, #tpu.memory_space<smem>>
    %30 = vector.broadcast %29 : f32 to vector<1x128xf32>
    %31 = arith.addf %28, %30 : vector<1x128xf32>
    %c1_19 = arith.constant 1 : index
    %c0_20 = arith.constant 0 : index
    %32 = vector.load %arg4[%c1_19, %c0_20] : memref<4x128xf32, #tpu.memory_space<vmem>>, vector<1x128xf32>
    tpu.vector_store %arg4[%c1_19, %c0_20], %31 {strides = array<i32>} : memref<4x128xf32, #tpu.memory_space<vmem>>, vector<1x128xf32>,
    %c2_21 = arith.constant 2 : index
    %c0_22 = arith.constant 0 : index
    %33 = memref.load %arg1[%c2_21, %c0_22] : memref<4x3xf32, #tpu.memory_space<smem>>
    %34 = vector.broadcast %33 : f32 to vector<1x128xf32>
    %35 = arith.mulf %34, %0 : vector<1x128xf32>
    %c2_23 = arith.constant 2 : index
    %c1_24 = arith.constant 1 : index
    %36 = memref.load %arg1[%c2_23, %c1_24] : memref<4x3xf32, #tpu.memory_space<smem>>
    %37 = vector.broadcast %36 : f32 to vector<1x128xf32>
    %38 = arith.mulf %37, %1 : vector<1x128xf32>
    %39 = arith.addf %35, %38 : vector<1x128xf32>
    %c2_25 = arith.constant 2 : index
    %c2_26 = arith.constant 2 : index
    %40 = memref.load %arg1[%c2_25, %c2_26] : memref<4x3xf32, #tpu.memory_space<smem>>
    %41 = vector.broadcast %40 : f32 to vector<1x128xf32>
    %42 = arith.mulf %41, %2 : vector<1x128xf32>
    %43 = arith.addf %39, %42 : vector<1x128xf32>
    %c2_27 = arith.constant 2 : index
    %44 = memref.load %arg2[%c2_27] : memref<4xf32, #tpu.memory_space<smem>>
    %45 = vector.broadcast %44 : f32 to vector<1x128xf32>
    %46 = arith.addf %43, %45 : vector<1x128xf32>
    %c2_28 = arith.constant 2 : index
    %c0_29 = arith.constant 0 : index
    %47 = vector.load %arg4[%c2_28, %c0_29] : memref<4x128xf32, #tpu.memory_space<vmem>>, vector<1x128xf32>
    tpu.vector_store %arg4[%c2_28, %c0_29], %46 {strides = array<i32>} : memref<4x128xf32, #tpu.memory_space<vmem>>, vector<1x128xf32>,
    %c3 = arith.constant 3 : index
    %c0_30 = arith.constant 0 : index
    %48 = memref.load %arg1[%c3, %c0_30] : memref<4x3xf32, #tpu.memory_space<smem>>
    %49 = vector.broadcast %48 : f32 to vector<1x128xf32>
    %50 = arith.mulf %49, %0 : vector<1x128xf32>
    %c3_31 = arith.constant 3 : index
    %c1_32 = arith.constant 1 : index
    %51 = memref.load %arg1[%c3_31, %c1_32] : memref<4x3xf32, #tpu.memory_space<smem>>
    %52 = vector.broadcast %51 : f32 to vector<1x128xf32>
    %53 = arith.mulf %52, %1 : vector<1x128xf32>
    %54 = arith.addf %50, %53 : vector<1x128xf32>
    %c3_33 = arith.constant 3 : index
    %c2_34 = arith.constant 2 : index
    %55 = memref.load %arg1[%c3_33, %c2_34] : memref<4x3xf32, #tpu.memory_space<smem>>
    %56 = vector.broadcast %55 : f32 to vector<1x128xf32>
    %57 = arith.mulf %56, %2 : vector<1x128xf32>
    %58 = arith.addf %54, %57 : vector<1x128xf32>
    %c3_35 = arith.constant 3 : index
    %59 = memref.load %arg2[%c3_35] : memref<4xf32, #tpu.memory_space<smem>>
    %60 = vector.broadcast %59 : f32 to vector<1x128xf32>
    %61 = arith.addf %58, %60 : vector<1x128xf32>
    %c3_36 = arith.constant 3 : index
    %c0_37 = arith.constant 0 : index
    %62 = vector.load %arg4[%c3_36, %c0_37] : memref<4x128xf32, #tpu.memory_space<vmem>>, vector<1x128xf32>
    tpu.vector_store %arg4[%c3_36, %c0_37], %61 {strides = array<i32>} : memref<4x128xf32, #tpu.memory_space<vmem>>, vector<1x128xf32>,
    return
  }
  func.func @transform_0(%arg0: i32) -> (i32, i32) {
    %c0_i32 = arith.constant 0 : i32
    %c0_i32_0 = arith.constant 0 : i32
    %c0_i32_1 = arith.constant 0 : i32
    return %c0_i32, %c0_i32_0 : i32, i32
  }
  func.func @transform_1(%arg0: i32) -> i32 {
    %c0_i32 = arith.constant 0 : i32
    %c0_i32_0 = arith.constant 0 : i32
    return %c0_i32 : i32
  }
  func.func @transform_2(%arg0: i32) -> (i32, i32) {
    %c0_i32 = arith.constant 0 : i32
    %c0_i32_0 = arith.constant 0 : i32
    return %c0_i32, %arg0 : i32, i32
  }
  func.func @transform_3(%arg0: i32) -> (i32, i32) {
    %c0_i32 = arith.constant 0 : i32
    %c0_i32_0 = arith.constant 0 : i32
    return %c0_i32, %arg0 : i32, i32
  }
}

</mosaic_0001>

<bundles_post_ra>
// kernel: tpu_custom_call.1
= control target key start
LH: loop header
LB: loop body
LE: loop exit
PB: predicated region body
PF: predicated region fallthrough
CT: control target
= control target key end

     0   :  { %8 = vsyncpa [#allocation4], 0  ;;  %s267_s0 = inlined_call_operand.hbm [shape: f32[4,3], index: 0, kind: input, shape index: {}]   ;;  %s268_s1 = inlined_call_operand.vmem [shape: f32[4], index: 1, kind: input, shape index: {}]   ;;  %s269_s2 = inlined_call_operand.vmem [shape: f32[3,128], index: 2, kind: input, shape index: {}]   ;;  %s270_s3 = inlined_call_operand.hbm [shape: f32[4,128], index: 3, kind: output, shape index: {}]  }
   0x1   :  { %9 = vsyncpa [#allocation5], 0 }
   0x2   :  { %10 = vsyncpa [#allocation3], 0  ;;  %s25_s14 = sshll.u32 %s268_s1, 4  ;;  %s134_s17 = scalar_lea.hbm %s267_s0, 64  ;;  %s26_s14 = int_to_ptr.vmem [resolvable:$true] %s25_s14 }
   0x3   :  { %p135_p0 = scmp.ne.s32.totalorder %s267_s0, %s134_s17  ;;  %p138_p1 = scmp.lt.u32.totalorder %s134_s17, %s267_s0 }
   0x5   :  { %p140_p2 = pnand %p138_p1, %p135_p0 }
   0x7   :  { %143 = shalt.err (!%p140_p2)
}
   0x8   :  { %s184_s22 = smov [#allocation2]   ;;  %s144_s1 = scalar_lea.vmem %s26_s14, 16 }
   0x9   :  { %18 = dma.hbm_to_smem %s267_s0, 64, %s184_s22, [#allocation4]  }
   0xa   :  { %p145_p3 = scmp.ne.s32.totalorder %s26_s14, %s144_s1  ;;  %p149_p4 = scmp.lt.s32.totalorder %s26_s14, %s26_s14 }
   0xb   :  { %p150_p5 = scmp.lt.s32.totalorder %s144_s1, %s144_s1 }
   0xd   :  { %p151_p6 = por %p150_p5, %p149_p4 }
   0xf   :  { %p152_p7 = pnand %p151_p6, %p145_p3 }
  0x11   :  { %155 = shalt.err (!%p152_p7)
}
  0x12   :  { %s185_s25 = smov [#allocation6]  }
  0x13   :  { %28 = dma.vmem_to_smem %s26_s14, 16, %s185_s25, [#allocation5]  }
  0x14   :  { %178 = dma.done.wait [#allocation4], 64  }
  0x15   :  { %179 = vsyncadd [#allocation4], 4294967232 }
  0x16   :  { %180 = dma.done.wait [#allocation5], 16  }
  0x17   :  { %181 = vsyncadd [#allocation5], 4294967280 }
  0x18   :  { %37 = sfence }
  0x19   :  { %s41_s26 = sld [smem:[#allocation2]]  ;;  %s117_s27 = sld [smem:[#allocation2 + $0x1]]  ;;  %v38_v0 = vld [vmem:[%s269_s2] sm:$0x1]  ;;  %v39_v1 = vld [vmem:[%s269_s2 + $0x1] sm:$0x1] }
  0x1a   :  { %s118_s28 = sld [smem:[#allocation2 + $0x2]]  ;;  %s222_s29 = sld [smem:[#allocation6]]  ;;  %v40_v2 = vld [vmem:[%s269_s2 + $0x2] sm:$0x1] }
  0x1b   :  { %s119_s0 = sld [smem:[#allocation2 + $0x80]]  ;;  %s120_s30 = sld [smem:[#allocation2 + $0x81]] }
  0x1c   :  { %s121_s6 = sld [smem:[#allocation2 + $0x82]]  ;;  %s227_s7 = sld [smem:[#allocation6 + $0x1]] }
  0x1d   :  { %s123_s10 = sld [smem:[#allocation2 + $0x100]]  ;;  %s124_s11 = sld [smem:[#allocation2 + $0x101]] }
  0x1e   :  { %s235_s14 = sld [smem:[#allocation2 + $0x102]]  ;;  %s239_s16 = sld [smem:[#allocation2 + $0x180]] }
  0x1f   :  { %s237_s15 = sld [smem:[#allocation6 + $0x2]]  ;;  %v42_v3 = vstv %s41_s26  ;;  %v45_v4 = vstv %s117_s27  ;;  %s241_s17 = sld [smem:[#allocation2 + $0x181]] }
  0x20   :  { %v43_v5 = vmul.f32 %v42_v3, %v38_v0  ;;  %v46_v6 = vmul.f32 %v45_v4, %v39_v1  ;;  %v49_v7 = vstv %s118_s28  ;;  %s243_s18 = sld [smem:[#allocation2 + $0x182]]  ;;  %s245_s2 = sld [smem:[#allocation6 + $0x3]]  ;;  %v53_v15 = vstv %s222_s29 }
  0x21   :  { %v50_v8 = vmul.f32 %v49_v7, %v40_v2  ;;  %v57_v9 = vstv %s119_s0  ;;  %v60_v10 = vstv %s120_s30  ;;  %s186_s19 = smov [#allocation7]  }
  0x22   :  { %v47_v11 = vadd.f32 %v46_v6, %v43_v5  ;;  %v58_v12 = vmul.f32 %v57_v9, %v38_v0  ;;  %v61_v13 = vmul.f32 %v60_v10, %v39_v1  ;;  %v64_v14 = vstv %s121_s6  ;;  %s107_s20 = sshll.u32 %s186_s19, 4  ;;  %s108_s20 = int_to_ptr.vmem [resolvable:$true] %s107_s20 }
  0x23   :  { %v65_v16 = vmul.f32 %v64_v14, %v40_v2  ;;  %v72_v17 = vstv %s123_s10  ;;  %v75_v18 = vstv %s124_s11  ;;  %v68_v23 = vstv %s227_s7  ;;  %s156_s21 = scalar_lea.vmem %s108_s20, 64  ;;  %p161_p9 = scmp.lt.s32.totalorder %s108_s20, %s108_s20 }
  0x24   :  { %v51_v19 = vadd.f32 %v50_v8, %v47_v11  ;;  %v62_v20 = vadd.f32 %v61_v13, %v58_v12  ;;  %v73_v21 = vmul.f32 %v72_v17, %v38_v0  ;;  %v76_v22 = vmul.f32 %v75_v18, %v39_v1  ;;  %p157_p8 = scmp.ne.s32.totalorder %s108_s20, %s156_s21  ;;  %p162_p10 = scmp.lt.s32.totalorder %s156_s21, %s156_s21 }
  0x25   :  { %v79_v24 = vstv %s235_s14  ;;  %v87_v25 = vstv %s239_s16  ;;  %v90_v26 = vstv %s241_s17  ;;  %v83_v31 = vstv %s237_s15 }
  0x26   :  { %v54_v27 = vadd.f32 %v53_v15, %v51_v19  ;;  %v66_v28 = vadd.f32 %v65_v16, %v62_v20  ;;  %v77_v29 = vadd.f32 %v76_v22, %v73_v21  ;;  %v80_v30 = vmul.f32 %v79_v24, %v40_v2  ;;  %p163_p11 = por %p162_p10, %p161_p9 }
  0x27   :  { %v88_v32 = vmul.f32 %v87_v25, %v38_v0  ;;  %v91_v33 = vmul.f32 %v90_v26, %v39_v1  ;;  %v94_v34 = vstv %s243_s18  ;;  %v98_v40 = vstv %s245_s2 }
  0x28   :  { %55 = vst [vmem:[#allocation7] sm:$0x1] %v54_v27  ;;  %v69_v35 = vadd.f32 %v68_v23, %v66_v28  ;;  %v81_v36 = vadd.f32 %v80_v30, %v77_v29  ;;  %v95_v37 = vmul.f32 %v94_v34, %v40_v2  ;;  %p164_p12 = pnand %p163_p11, %p157_p8 }
  0x29   :  { %v92_v38 = vadd.f32 %v91_v33, %v88_v32 }
  0x2a   :  { %70 = vst [vmem:[#allocation7 + $0x1] sm:$0x1] %v69_v35  ;;  %v84_v39 = vadd.f32 %v83_v31, %v81_v36 }
  0x2b   :  { %v96_v41 = vadd.f32 %v95_v37, %v92_v38 }
  0x2c   :  { %85 = vst [vmem:[#allocation7 + $0x2] sm:$0x1] %v84_v39 }
  0x2d   :  { %v99_v42 = vadd.f32 %v98_v40, %v96_v41 }
  0x2f   :  { %100 = vst [vmem:[#allocation7 + $0x3] sm:$0x1] %v99_v42 }
  0x30   :  { %167 = shalt.err (!%p164_p12)
}
  0x31   :  { %s168_s24 = scalar_lea.hbm %s270_s3, 64 }
  0x32   :  { %p169_p13 = scmp.ne.s32.totalorder %s270_s3, %s168_s24  ;;  %p172_p0 = scmp.lt.u32.totalorder %s168_s24, %s270_s3 }
  0x34   :  { %p174_p1 = pnand %p172_p0, %p169_p13 }
  0x36   :  { %177 = shalt.err (!%p174_p1)
}
  0x37   :  { %110 = dma.vmem_to_hbm [thread:$0]  %s108_s20, 64, %s270_s3, [#allocation3]  }
  0x38   :  { %182 = dma.done.wait [#allocation3], 64  }
  0x39   :  { %183 = vsyncadd [#allocation3], 4294967232 }
  0x3a   :  { %114 = vsyncpa [#allocation3], 1 }
  0x3b   :  { %115 = vsyncpa [#allocation4], 1 }
  0x3c   :  { %116 = vsyncpa [#allocation5], 1 }

</bundles_post_ra>
